<compile_context>
chip_gen: v6e
topology: v6e:2x2x1
jax: 0.10.0
libtpu: 0.0.40
codegen_flags: <defaults>
</compile_context>

<pallas_src>
import functools

import jax
import jax.numpy as jnp
from jax.experimental import pallas as pl
from jax.experimental.pallas import tpu as pltpu


def _round_up(x, m):
    return ((x + m - 1) // m) * m


def _log_sigmoid(x):
    # numerically stable: log(sigmoid(x)) = min(x, 0) - log1p(exp(-|x|))
    # exp/log go to the EUP slot (free filler next to the VPU/MXU work).
    return jnp.minimum(x, 0.0) - jnp.log1p(jnp.exp(-jnp.abs(x)))


def _skipgram_kernel(nvalid_ref, upos_ref, vpos_ref, vneg_ref,
                     u_tab_ref, v_tab_ref, out_ref, *,
                     k_neg, vocab_pad, tile_b):
    tab_dtype = u_tab_ref.dtype
    u_tab = u_tab_ref[...]                       # (Vp, Dp) table dtype
    v_tab = v_tab_ref[...]                       # (Vp, Dp)

    lane_iota = jax.lax.broadcasted_iota(jnp.int32, (tile_b, vocab_pad), 1)

    # --- gather u rows: one-hot(u_pos) @ u_table (MXU) ---
    upos = upos_ref[...]                         # (TB, 1) int32
    oh_u = (lane_iota == upos).astype(tab_dtype)                 # (TB, Vp)
    eu = jnp.dot(oh_u, u_tab, preferred_element_type=jnp.float32)  # (TB, Dp) f32

    # --- gather positive v rows and positive score ---
    vpos = vpos_ref[...]                         # (TB, 1) int32
    oh_v = (lane_iota == vpos).astype(tab_dtype)
    pv = jnp.dot(oh_v, v_tab, preferred_element_type=jnp.float32)
    pos_score = jnp.sum(eu * pv, axis=-1, keepdims=True)        # (TB, 1)

    # --- gather + K-sum negatives in one multi-hot matmul ---
    vneg = vneg_ref[...]                         # (TB, K) int32
    mhot = (lane_iota == vneg[:, 0:1]).astype(tab_dtype)
    for k in range(1, k_neg):
        mhot = mhot + (lane_iota == vneg[:, k:k + 1]).astype(tab_dtype)
    nv_sum = jnp.dot(mhot, v_tab, preferred_element_type=jnp.float32)
    neg_score = jnp.sum(eu * nv_sum, axis=-1, keepdims=True)    # (TB, 1)

    cost = _log_sigmoid(pos_score) + _log_sigmoid(-neg_score)   # (TB, 1)

    # Mask batch-padding rows (dynamic n_valid from SMEM -> no recompile per B).
    row = (pl.program_id(0) * tile_b
           + jax.lax.broadcasted_iota(jnp.int32, (tile_b, 1), 0))
    cost = jnp.where(row < nvalid_ref[0], cost, 0.0)

    # Per-tile partial sum into this tile's own (8,128)-aligned output block.
    out_ref[...] = jnp.full((1, 8, 128), jnp.sum(cost), dtype=jnp.float32)


def skipgram_loss_pallas(u_emb, v_emb, u_pos, v_pos, v_neg, batch_size):
    """SkipGram negative-sampling loss (matches the PyTorch module's forward)."""
    V, D = u_emb.shape
    B = u_pos.shape[0]
    K = v_neg.shape[1]

    # Pad only the (small) tables: zero rows are never selected (idx < V) and
    # zero feature columns contribute 0 to the dot products.  One-time,
    # read-once cost; the gathered activations are never materialized in HBM.
    d_pad = _round_up(D, 128)
    v_pad = _round_up(V, 128)
    u_tab = jnp.pad(u_emb, ((0, v_pad - V), (0, d_pad - D)))
    v_tab = jnp.pad(v_emb, ((0, v_pad - V), (0, d_pad - D)))

    # Batch tiling: >=2 tiles when B >= 16 (v7x megacore), cap at 256 rows to
    # bound vreg / spill pressure of the (TB, Vp) one-hot.
    tile_b = max(8, min(256, _round_up((B + 1) // 2, 8)))
    b_pad = _round_up(B, tile_b)
    n_tiles = b_pad // tile_b

    upos2 = jnp.pad(u_pos.astype(jnp.int32), (0, b_pad - B)).reshape(b_pad, 1)
    vpos2 = jnp.pad(v_pos.astype(jnp.int32), (0, b_pad - B)).reshape(b_pad, 1)
    vneg2 = jnp.pad(v_neg.astype(jnp.int32), ((0, b_pad - B), (0, 0)))
    n_valid = jnp.array([B], dtype=jnp.int32)

    elem = u_tab.dtype.itemsize
    table_bytes = 2 * v_pad * d_pad * elem
    idx_bytes = tile_b * (2 + K) * 4
    out_bytes = 8 * 128 * 4
    live_bytes = tile_b * (v_pad + 3 * d_pad) * 4      # rough spill headroom
    vmem_needed = 2 * (table_bytes + idx_bytes + out_bytes) + live_bytes + (4 << 20)
    vmem_limit = int(min(64 << 20, max(16 << 20, vmem_needed)))

    cost_estimate = pl.CostEstimate(
        flops=2 * b_pad * (3 * v_pad * d_pad + 2 * d_pad),
        transcendentals=4 * b_pad,
        bytes_accessed=table_bytes + b_pad * (2 + K) * 4 + n_tiles * out_bytes,
    )

    kernel = functools.partial(
        _skipgram_kernel, k_neg=K, vocab_pad=v_pad, tile_b=tile_b)

    partials = pl.pallas_call(
        kernel,
        out_shape=jax.ShapeDtypeStruct((n_tiles, 8, 128), jnp.float32),
        grid_spec=pltpu.PrefetchScalarGridSpec(
            num_scalar_prefetch=1,
            grid=(n_tiles,),
            in_specs=[
                pl.BlockSpec((tile_b, 1), lambda i, n: (i, 0)),     # u_pos
                pl.BlockSpec((tile_b, 1), lambda i, n: (i, 0)),     # v_pos
                pl.BlockSpec((tile_b, K), lambda i, n: (i, 0)),     # v_neg
                pl.BlockSpec((v_pad, d_pad), lambda i, n: (0, 0)),  # u table (VMEM-resident)
                pl.BlockSpec((v_pad, d_pad), lambda i, n: (0, 0)),  # v table (VMEM-resident)
            ],
            out_specs=pl.BlockSpec((1, 8, 128), lambda i, n: (i, 0, 0)),
        ),
        compiler_params=pltpu.CompilerParams(
            dimension_semantics=("parallel",),
            vmem_limit_bytes=vmem_limit),
        cost_estimate=cost_estimate,
    )(n_valid, upos2, vpos2, vneg2, u_tab, v_tab)

    # Tiny final reduction + scale in JAX.
    return -jnp.sum(partials[:, 0, 0]) / batch_size


def skipgram_loss_ref(u_emb, v_emb, u_pos, v_pos, v_neg, batch_size):
    """Pure-JAX reference mirroring the PyTorch forward exactly."""
    embed_u = u_emb[u_pos]
    pos_embed_v = v_emb[v_pos]
    pos_score = jnp.sum(embed_u * pos_embed_v, axis=1)
    pos_output = jax.nn.log_sigmoid(pos_score)
    neg_embed_v = v_emb[v_neg]
    neg_score = jnp.squeeze(
        jnp.einsum("bkd,bdo->bko", neg_embed_v, embed_u[:, :, None]), axis=-1
    )
    neg_score = jnp.sum(neg_score, axis=1)
    neg_output = jax.nn.log_sigmoid(-neg_score)
    cost = pos_output + neg_output
    return -jnp.sum(cost) / batch_size


if __name__ == "__main__":
    vocab_size = 64
    embedding_dim = 32
    batch = 8
    num_neg = 5

    key = jax.random.PRNGKey(0)
    ku, kv, k1, k2, k3 = jax.random.split(key, 5)

    initrange = 0.5 / embedding_dim
    # u_embeddings: uniform(-initrange, initrange), as in the module's __init__.
    u_emb = jax.random.uniform(
        ku, (vocab_size, embedding_dim), jnp.float32, -initrange, initrange
    )
    # The module zero-inits v_embeddings; use small non-zero values instead so
    # the kernel math is actually exercised.
    v_emb = jax.random.uniform(
        kv, (vocab_size, embedding_dim), jnp.float32, -initrange, initrange
    )

    u_pos = jax.random.randint(k1, (batch,), 0, vocab_size, dtype=jnp.int32)
    v_pos = jax.random.randint(k2, (batch,), 0, vocab_size, dtype=jnp.int32)
    v_neg = jax.random.randint(k3, (batch, num_neg), 0, vocab_size, dtype=jnp.int32)

    loss = skipgram_loss_pallas(u_emb, v_emb, u_pos, v_pos, v_neg, batch)
    loss = jax.block_until_ready(loss)

    ref = skipgram_loss_ref(u_emb, v_emb, u_pos, v_pos, v_neg, batch)
    assert jnp.allclose(loss, ref, atol=1e-5, rtol=1e-5), (loss, ref)

    print("KERNEL_OK")
</pallas_src>

<mosaic_0001>
module attributes {stable_mosaic.version = 11 : i64} {
  func.func @_skipgram_kernel(%arg0: i32, %arg1: memref<1xi32, #tpu.memory_space<smem>>, %arg2: memref<8x1xi32, #tpu.memory_space<vmem>>, %arg3: memref<8x1xi32, #tpu.memory_space<vmem>>, %arg4: memref<8x5xi32, #tpu.memory_space<vmem>>, %arg5: memref<128x128xf32, #tpu.memory_space<vmem>>, %arg6: memref<128x128xf32, #tpu.memory_space<vmem>>, %arg7: memref<1x8x128xf32, #tpu.memory_space<vmem>>) attributes {dimension_semantics = [#tpu.dimension_semantics<parallel>], iteration_bounds = array<i64: 1>, scalar_prefetch = 1 : i64, scratch_operands = 0 : i64, tpu.core_type = #tpu.core_type<tc>, window_params = [{transform_indices = @transform_0, window_bounds = array<i64: 8, 1>}, {transform_indices = @transform_1, window_bounds = array<i64: 8, 1>}, {transform_indices = @transform_2, window_bounds = array<i64: 8, 5>}, {pipeline_mode = #tpu.pipeline_mode<synchronous>, transform_indices = @transform_3, window_bounds = array<i64: 128, 128>}, {pipeline_mode = #tpu.pipeline_mode<synchronous>, transform_indices = @transform_4, window_bounds = array<i64: 128, 128>}, {transform_indices = @transform_5, window_bounds = array<i64: 1, 8, 128>}]} {
    %c0 = arith.constant 0 : index
    %c0_0 = arith.constant 0 : index
    %0 = vector.load %arg5[%c0, %c0_0] : memref<128x128xf32, #tpu.memory_space<vmem>>, vector<128x128xf32>
    %c0_1 = arith.constant 0 : index
    %c0_2 = arith.constant 0 : index
    %1 = vector.load %arg6[%c0_1, %c0_2] : memref<128x128xf32, #tpu.memory_space<vmem>>, vector<128x128xf32>
    %2 = tpu.iota {dimensions = array<i32: 1>} : vector<8x128xi32>
    %c0_3 = arith.constant 0 : index
    %c0_4 = arith.constant 0 : index
    %3 = vector.load %arg2[%c0_3, %c0_4] : memref<8x1xi32, #tpu.memory_space<vmem>>, vector<8x1xi32>
    %4 = vector.broadcast %3 : vector<8x1xi32> to vector<8x128xi32>
    %5 = arith.cmpi eq, %2, %4 : vector<8x128xi32>
    %6 = arith.extui %5 : vector<8x128xi1> to vector<8x128xi32>
    %7 = arith.sitofp %6 : vector<8x128xi32> to vector<8x128xf32>
    %cst = arith.constant dense<0.000000e+00> : vector<8x128xf32>
    %8 = tpu.matmul %7, %0, %cst {dimension_numbers = #tpu.dot_dimension_numbers<[1], [0], [0], [1], [0, 0, 1, 1], [], []>} : vector<8x128xf32>, vector<128x128xf32>, vector<8x128xf32> -> vector<8x128xf32>
    %c0_5 = arith.constant 0 : index
    %c0_6 = arith.constant 0 : index
    %9 = vector.load %arg3[%c0_5, %c0_6] : memref<8x1xi32, #tpu.memory_space<vmem>>, vector<8x1xi32>
    %10 = vector.broadcast %9 : vector<8x1xi32> to vector<8x128xi32>
    %11 = arith.cmpi eq, %2, %10 : vector<8x128xi32>
    %12 = arith.extui %11 : vector<8x128xi1> to vector<8x128xi32>
    %13 = arith.sitofp %12 : vector<8x128xi32> to vector<8x128xf32>
    %cst_7 = arith.constant dense<0.000000e+00> : vector<8x128xf32>
    %14 = tpu.matmul %13, %1, %cst_7 {dimension_numbers = #tpu.dot_dimension_numbers<[1], [0], [0], [1], [0, 0, 1, 1], [], []>} : vector<8x128xf32>, vector<128x128xf32>, vector<8x128xf32> -> vector<8x128xf32>
    %15 = arith.mulf %8, %14 : vector<8x128xf32>
    %cst_8 = arith.constant dense<0.000000e+00> : vector<8xf32>
    %16 = vector.multi_reduction <add>, %15, %cst_8 [1] : vector<8x128xf32> to vector<8xf32>
    %17 = vector.shape_cast %16 : vector<8xf32> to vector<8x1xf32>
    %c0_9 = arith.constant 0 : index
    %c0_10 = arith.constant 0 : index
    %18 = vector.load %arg4[%c0_9, %c0_10] : memref<8x5xi32, #tpu.memory_space<vmem>>, vector<8x5xi32>
    %19 = vector.extract_strided_slice %18 {offsets = [0, 0], sizes = [8, 1], strides = [1, 1]} : vector<8x5xi32> to vector<8x1xi32>
    %20 = vector.broadcast %19 : vector<8x1xi32> to vector<8x128xi32>
    %21 = arith.cmpi eq, %2, %20 : vector<8x128xi32>
    %22 = arith.extui %21 : vector<8x128xi1> to vector<8x128xi32>
    %23 = arith.sitofp %22 : vector<8x128xi32> to vector<8x128xf32>
    %24 = vector.extract_strided_slice %18 {offsets = [0, 1], sizes = [8, 1], strides = [1, 1]} : vector<8x5xi32> to vector<8x1xi32>
    %25 = vector.broadcast %24 : vector<8x1xi32> to vector<8x128xi32>
    %26 = arith.cmpi eq, %2, %25 : vector<8x128xi32>
    %27 = arith.extui %26 : vector<8x128xi1> to vector<8x128xi32>
    %28 = arith.sitofp %27 : vector<8x128xi32> to vector<8x128xf32>
    %29 = arith.addf %23, %28 : vector<8x128xf32>
    %30 = vector.extract_strided_slice %18 {offsets = [0, 2], sizes = [8, 1], strides = [1, 1]} : vector<8x5xi32> to vector<8x1xi32>
    %31 = vector.broadcast %30 : vector<8x1xi32> to vector<8x128xi32>
    %32 = arith.cmpi eq, %2, %31 : vector<8x128xi32>
    %33 = arith.extui %32 : vector<8x128xi1> to vector<8x128xi32>
    %34 = arith.sitofp %33 : vector<8x128xi32> to vector<8x128xf32>
    %35 = arith.addf %29, %34 : vector<8x128xf32>
    %36 = vector.extract_strided_slice %18 {offsets = [0, 3], sizes = [8, 1], strides = [1, 1]} : vector<8x5xi32> to vector<8x1xi32>
    %37 = vector.broadcast %36 : vector<8x1xi32> to vector<8x128xi32>
    %38 = arith.cmpi eq, %2, %37 : vector<8x128xi32>
    %39 = arith.extui %38 : vector<8x128xi1> to vector<8x128xi32>
    %40 = arith.sitofp %39 : vector<8x128xi32> to vector<8x128xf32>
    %41 = arith.addf %35, %40 : vector<8x128xf32>
    %42 = vector.extract_strided_slice %18 {offsets = [0, 4], sizes = [8, 1], strides = [1, 1]} : vector<8x5xi32> to vector<8x1xi32>
    %43 = vector.broadcast %42 : vector<8x1xi32> to vector<8x128xi32>
    %44 = arith.cmpi eq, %2, %43 : vector<8x128xi32>
    %45 = arith.extui %44 : vector<8x128xi1> to vector<8x128xi32>
    %46 = arith.sitofp %45 : vector<8x128xi32> to vector<8x128xf32>
    %47 = arith.addf %41, %46 : vector<8x128xf32>
    %cst_11 = arith.constant dense<0.000000e+00> : vector<8x128xf32>
    %48 = tpu.matmul %47, %1, %cst_11 {dimension_numbers = #tpu.dot_dimension_numbers<[1], [0], [0], [1], [0, 0, 1, 1], [], []>} : vector<8x128xf32>, vector<128x128xf32>, vector<8x128xf32> -> vector<8x128xf32>
    %49 = arith.mulf %8, %48 : vector<8x128xf32>
    %cst_12 = arith.constant dense<0.000000e+00> : vector<8xf32>
    %50 = vector.multi_reduction <add>, %49, %cst_12 [1] : vector<8x128xf32> to vector<8xf32>
    %51 = vector.shape_cast %50 : vector<8xf32> to vector<8x1xf32>
    %cst_13 = arith.constant 0.000000e+00 : f32
    %52 = vector.broadcast %cst_13 : f32 to vector<8x1xf32>
    %53 = arith.minimumf %17, %52 : vector<8x1xf32>
    %54 = math.absf %17 : vector<8x1xf32>
    %cst_14 = arith.constant 0.000000e+00 : f32
    %55 = vector.broadcast %cst_14 : f32 to vector<8x1xf32>
    %56 = arith.subf %55, %54 : vector<8x1xf32>
    %57 = math.exp %56 : vector<8x1xf32>
    %58 = math.log1p %57 : vector<8x1xf32>
    %59 = arith.subf %53, %58 : vector<8x1xf32>
    %cst_15 = arith.constant 0.000000e+00 : f32
    %60 = vector.broadcast %cst_15 : f32 to vector<8x1xf32>
    %61 = arith.subf %60, %51 : vector<8x1xf32>
    %cst_16 = arith.constant 0.000000e+00 : f32
    %62 = vector.broadcast %cst_16 : f32 to vector<8x1xf32>
    %63 = arith.minimumf %61, %62 : vector<8x1xf32>
    %64 = math.absf %61 : vector<8x1xf32>
    %cst_17 = arith.constant 0.000000e+00 : f32
    %65 = vector.broadcast %cst_17 : f32 to vector<8x1xf32>
    %66 = arith.subf %65, %64 : vector<8x1xf32>
    %67 = math.exp %66 : vector<8x1xf32>
    %68 = math.log1p %67 : vector<8x1xf32>
    %69 = arith.subf %63, %68 : vector<8x1xf32>
    %70 = arith.addf %59, %69 : vector<8x1xf32>
    %c8_i32 = arith.constant 8 : i32
    %71 = arith.muli %arg0, %c8_i32 : i32
    %72 = tpu.iota {dimensions = array<i32: 0>} : vector<8x1xi32>
    %73 = vector.broadcast %71 : i32 to vector<8x1xi32>
    %74 = arith.addi %73, %72 : vector<8x1xi32>
    %c0_18 = arith.constant 0 : index
    %75 = memref.load %arg1[%c0_18] : memref<1xi32, #tpu.memory_space<smem>>
    %76 = vector.broadcast %75 : i32 to vector<8x1xi32>
    %77 = arith.cmpi slt, %74, %76 : vector<8x1xi32>
    %cst_19 = arith.constant 0.000000e+00 : f32
    %78 = vector.broadcast %cst_19 : f32 to vector<8x1xf32>
    %79 = arith.select %77, %70, %78 : vector<8x1xi1>, vector<8x1xf32>
    %80 = vector.shape_cast %79 : vector<8x1xf32> to vector<1x8x1xf32>
    %cst_20 = arith.constant dense<0.000000e+00> : vector<1xf32>
    %81 = vector.multi_reduction <add>, %80, %cst_20 [1, 2] : vector<1x8x1xf32> to vector<1xf32>
    %82 = vector.shape_cast %81 : vector<1xf32> to vector<1x1x1xf32>
    %83 = vector.extract %82[0, 0, 0] : f32 from vector<1x1x1xf32>
    %84 = vector.broadcast %83 : f32 to vector<1x8x128xf32>
    %c0_21 = arith.constant 0 : index
    %c0_22 = arith.constant 0 : index
    %c0_23 = arith.constant 0 : index
    %85 = vector.load %arg7[%c0_21, %c0_22, %c0_23] : memref<1x8x128xf32, #tpu.memory_space<vmem>>, vector<1x8x128xf32>
    tpu.vector_store %arg7[%c0_21, %c0_22, %c0_23], %84 {strides = array<i32>} : memref<1x8x128xf32, #tpu.memory_space<vmem>>, vector<1x8x128xf32>,
    return
  }
  func.func @transform_0(%arg0: i32, %arg1: memref<1xi32, #tpu.memory_space<smem>>) -> (i32, i32) {
    %c0_i32 = arith.constant 0 : i32
    %c0_i32_0 = arith.constant 0 : i32
    return %arg0, %c0_i32 : i32, i32
  }
  func.func @transform_1(%arg0: i32, %arg1: memref<1xi32, #tpu.memory_space<smem>>) -> (i32, i32) {
    %c0_i32 = arith.constant 0 : i32
    %c0_i32_0 = arith.constant 0 : i32
    return %arg0, %c0_i32 : i32, i32
  }
  func.func @transform_2(%arg0: i32, %arg1: memref<1xi32, #tpu.memory_space<smem>>) -> (i32, i32) {
    %c0_i32 = arith.constant 0 : i32
    %c0_i32_0 = arith.constant 0 : i32
    return %arg0, %c0_i32 : i32, i32
  }
  func.func @transform_3(%arg0: i32, %arg1: memref<1xi32, #tpu.memory_space<smem>>) -> (i32, i32) {
    %c0_i32 = arith.constant 0 : i32
    %c0_i32_0 = arith.constant 0 : i32
    %c0_i32_1 = arith.constant 0 : i32
    return %c0_i32, %c0_i32_0 : i32, i32
  }
  func.func @transform_4(%arg0: i32, %arg1: memref<1xi32, #tpu.memory_space<smem>>) -> (i32, i32) {
    %c0_i32 = arith.constant 0 : i32
    %c0_i32_0 = arith.constant 0 : i32
    %c0_i32_1 = arith.constant 0 : i32
    return %c0_i32, %c0_i32_0 : i32, i32
  }
  func.func @transform_5(%arg0: i32, %arg1: memref<1xi32, #tpu.memory_space<smem>>) -> (i32, i32, i32) {
    %c0_i32 = arith.constant 0 : i32
    %c0_i32_0 = arith.constant 0 : i32
    %c0_i32_1 = arith.constant 0 : i32
    return %arg0, %c0_i32, %c0_i32_0 : i32, i32, i32
  }
}

</mosaic_0001>

<bundles_post_ra>
// kernel: tpu_custom_call.1
= control target key start
LH: loop header
LB: loop body
LE: loop exit
PB: predicated region body
PF: predicated region fallthrough
CT: control target
= control target key end

     0   :  { %12 = vsyncpa [#allocation5], 0  ;;  %s869_s0 = inlined_call_operand.<no memory space> [shape: s32[1], index: 0, kind: input, shape index: {}]   ;;  %s870_s1 = inlined_call_operand.vmem [shape: s32[8,1], index: 1, kind: input, shape index: {}]   ;;  %s871_s2 = inlined_call_operand.vmem [shape: s32[8,1], index: 2, kind: input, shape index: {}]   ;;  %s872_s3 = inlined_call_operand.vmem [shape: s32[8,5], index: 3, kind: input, shape index: {}]   ;;  %s873_s4 = inlined_call_operand.hbm [shape: f32[128,128], index: 4, kind: input, shape index: {}]   ;;  %s874_s5 = inlined_call_operand.hbm [shape: f32[128,128], index: 5, kind: input, shape index: {}]   ;;  %s875_s6 = inlined_call_operand.hbm [shape: f32[1,8,128], index: 6, kind: output, shape index: {}]  }
   0x1   :  { %13 = vsyncpa [#allocation8], 0 }
   0x2   :  { %14 = vsyncpa [#allocation6], 0  ;;  %s681_s21 = smov [#allocation4]  }
   0x3   :  { %s26_s22 = sshll.u32 %s681_s21, 4  ;;  %s27_s22 = int_to_ptr.vmem [resolvable:$true] %s26_s22 }
   0x4   :  { %s623_s23 = scalar_lea.vmem %s27_s22, 2048  ;;  %p628_p1 = scmp.lt.s32.totalorder %s27_s22, %s27_s22 }
   0x5   :  { %p624_p0 = scmp.ne.s32.totalorder %s27_s22, %s623_s23  ;;  %p629_p2 = scmp.lt.s32.totalorder %s623_s23, %s623_s23 }
   0x7   :  { %p630_p3 = por %p629_p2, %p628_p1 }
   0x9   :  { %p631_p4 = pnand %p630_p3, %p624_p0 }
   0xb   :  { %634 = shalt.err (!%p631_p4)
}
   0xc   :  { %s682_s24 = smov 128   ;;  %s683_s25 = smov 8  }
   0xd   :  { %32 = dma.hbm_to_vmem [thread:$0]  %s873_s4, 2048, %s27_s22, [#allocation5], %s682_s24, %s682_s24, %s683_s25  }
   0xe   :  { %s684_s28 = smov [#allocation7]  }
   0xf   :  { %s38_s29 = sshll.u32 %s684_s28, 4  ;;  %s39_s29 = int_to_ptr.vmem [resolvable:$true] %s38_s29 }
  0x10   :  { %s643_s30 = scalar_lea.vmem %s39_s29, 2048  ;;  %p648_p6 = scmp.lt.s32.totalorder %s39_s29, %s39_s29 }
  0x11   :  { %p644_p5 = scmp.ne.s32.totalorder %s39_s29, %s643_s30  ;;  %p649_p7 = scmp.lt.s32.totalorder %s643_s30, %s643_s30 }
  0x13   :  { %p650_p8 = por %p649_p7, %p648_p6 }
  0x15   :  { %p651_p9 = pnand %p650_p8, %p644_p5 }
  0x17   :  { %654 = shalt.err (!%p651_p9)
}
  0x18   :  { %44 = dma.hbm_to_vmem [thread:$0]  %s874_s5, 2048, %s39_s29, [#allocation8], %s682_s24, %s682_s24, %s683_s25  }
  0x19   :  { %675 = dma.done.wait [#allocation5], 2048  }
  0x1a   :  { %676 = vsyncadd [#allocation5], 4294965248 }
  0x1b   :  { %677 = dma.done.wait [#allocation8], 2048  }
  0x1c   :  { %678 = vsyncadd [#allocation8], 4294965248  ;;  %v685_v0 = vmov 1   ;;  %v686_v1 = vmov 0   ;;  %v687_v2 = vmov 0.0   ;;  %vm688_vm0 = vmmov 0  }
  0x1d   :  { %601 = vset.pattern.permute.xlu1 %v685_v0  ;;  %600 = vset.pattern.permute.xlu0 %v686_v1  ;;  %v242_v3 = vld [vmem:[%s872_s3] sm:$0xff]  ;;  %v66_v5 = vld [vmem:[#allocation4 + $0x78] sm:$0xff]  ;;  %v65_v6 = vld [vmem:[#allocation4 + $0x70] sm:$0xff]  ;;  %v689_v9 = vmov 2   ;;  %v690_v11 = vmov 3   ;;  %v691_v14 = vmov 4   ;;  %v83_v41 = vlaneseq }
  0x1e   :  { %480 = vmatprep.subr.mxu0 %v687_v2  ;;  %515 = vmatprep.subr.mxu1 %v687_v2  ;;  %v85_v4 = vld [vmem:[%s870_s1] sm:$0xff]  ;;  %v64_v7 = vld [vmem:[#allocation4 + $0x68] sm:$0xff]  ;;  %v748_v8 = vld [vmem:[#allocation7 + $0x78] sm:$0xff]  ;;  %v692_v45 = vmov 1.0   ;;  %vm391_vm11 = vcmask 7168   ;;  %s693_s12 = smov [#allocation9]  }
  0x1f   :  { %512 = vmatprep.mubr.msk.f32.mxu0 %vm688_vm0, %v687_v2  ;;  %547 = vmatprep.mubr.msk.f32.mxu1 %vm688_vm0, %v687_v2  ;;  %v63_v10 = vld [vmem:[#allocation4 + $0x60] sm:$0xff]  ;;  %v62_v12 = vld [vmem:[#allocation4 + $0x58] sm:$0xff]  ;;  %v754_v13 = vld [vmem:[#allocation7 + $0x70] sm:$0xff]  ;;  %v84_v42 = vand.u32 127, %v83_v41  ;;  %s410_s13 = sshll.u32 %s693_s12, 4  ;;  %s411_s13 = int_to_ptr.vmem [resolvable:$true] %s410_s13 }
  0x20   :  { %250 = vperm.xlu1 %601, %v242_v3   ;;  %87 = vperm.xlu0 %600, %v85_v4   ;;  %v61_v15 = vld [vmem:[#allocation4 + $0x50] sm:$0xff]  ;;  %v758_v16 = vld [vmem:[#allocation7 + $0x68] sm:$0xff]  ;;  %v162_v17 = vld [vmem:[%s871_s2] sm:$0xff]  ;;  %s655_s14 = scalar_lea.vmem %s411_s13, 128  ;;  %p660_p11 = scmp.lt.s32.totalorder %s411_s13, %s411_s13 }
  0x21   :  { %481 = vmatpush3.msra.mxu0 %v66_v5  ;;  %516 = vmatpush3.msra.mxu1 %v748_v8  ;;  %v60_v18 = vld [vmem:[#allocation4 + $0x48] sm:$0xff]  ;;  %v59_v19 = vld [vmem:[#allocation4 + $0x40] sm:$0xff]  ;;  %v58_v21 = vld [vmem:[#allocation4 + $0x38] sm:$0xff]  ;;  %p656_p10 = scmp.ne.s32.totalorder %s411_s13, %s655_s14  ;;  %p661_p12 = scmp.lt.s32.totalorder %s655_s14, %s655_s14 }
  0x22   :  { %482 = vmatprep.subr.mxu0 %v687_v2  ;;  %517 = vmatprep.subr.mxu1 %v687_v2  ;;  %v768_v20 = vld [vmem:[#allocation7 + $0x60] sm:$0xff]  ;;  %v772_v22 = vld [vmem:[#allocation7 + $0x58] sm:$0xff]  ;;  %v57_v23 = vld [vmem:[#allocation4 + $0x30] sm:$0xff] }
  0x23   :  { %483 = vmatpush3.msra.mxu0 %v65_v6  ;;  %518 = vmatpush3.msra.mxu1 %v754_v13  ;;  %v777_v24 = vld [vmem:[#allocation7 + $0x50] sm:$0xff]  ;;  %v56_v25 = vld [vmem:[#allocation4 + $0x28] sm:$0xff]  ;;  %v55_v27 = vld [vmem:[#allocation4 + $0x20] sm:$0xff]  ;;  %p662_p13 = por %p661_p12, %p660_p11 }
  0x24   :  { %602 = vset.pattern.permute.xlu1 %v689_v9  ;;  %244 = vperm.xlu0 %600, %v242_v3   ;;  %v782_v26 = vld [vmem:[#allocation7 + $0x48] sm:$0xff]  ;;  %v787_v28 = vld [vmem:[#allocation7 + $0x40] sm:$0xff]  ;;  %v54_v29 = vld [vmem:[#allocation4 + $0x18] sm:$0xff] }
  0x25   :  { %257 = vperm.xlu1 %602, %v242_v3   ;;  %484 = vmatprep.subr.mxu0 %v687_v2  ;;  %v792_v30 = vld [vmem:[#allocation7 + $0x38] sm:$0xff]  ;;  %v53_v31 = vld [vmem:[#allocation4 + $0x10] sm:$0xff]  ;;  %v52_v33 = vld [vmem:[#allocation4 + $0x8] sm:$0xff]  ;;  %p663_p0 = pnand %p662_p13, %p656_p10 }
  0x26   :  { %485 = vmatpush3.msra.mxu0 %v64_v7  ;;  %519 = vmatprep.subr.mxu1 %v687_v2  ;;  %v797_v32 = vld [vmem:[#allocation7 + $0x30] sm:$0xff]  ;;  %v802_v34 = vld [vmem:[#allocation7 + $0x28] sm:$0xff]  ;;  %v51_v35 = vld [vmem:[#allocation4] sm:$0xff] }
  0x27   :  { %486 = vmatprep.subr.mxu0 %v687_v2  ;;  %520 = vmatpush3.msra.mxu1 %v758_v16  ;;  %v807_v36 = vld [vmem:[#allocation7 + $0x20] sm:$0xff]  ;;  %v812_v37 = vld [vmem:[#allocation7 + $0x18] sm:$0xff]  ;;  %v817_v38 = vld [vmem:[#allocation7 + $0x10] sm:$0xff] }
  0x28   :  { %603 = vset.pattern.permute.xlu0 %v690_v11  ;;  %487 = vmatpush3.msra.mxu0 %v63_v10  ;;  %v68_v39 = vld [vmem:[#allocation7 + $0x8] sm:$0xff]  ;;  %v67_v40 = vld [vmem:[#allocation7] sm:$0xff] }
  0x29   :  { %604 = vset.pattern.permute.xlu1 %v691_v14  ;;  %264 = vperm.xlu0 %603, %v242_v3  }
  0x2a   :  { %271 = vperm.xlu1 %604, %v242_v3   ;;  %488 = vmatprep.subr.mxu0 %v687_v2 }
  0x2b   :  { %489 = vmatpush3.msra.mxu0 %v62_v12  ;;  %521 = vmatprep.subr.mxu1 %v687_v2 }
  0x2c   :  { %490 = vmatprep.subr.mxu0 %v687_v2  ;;  %522 = vmatpush3.msra.mxu1 %v768_v20 }
  0x2d   :  { %491 = vmatpush3.msra.mxu0 %v61_v15  ;;  %523 = vmatprep.subr.mxu1 %v687_v2 }
  0x2e   :  { %605 = vset.pattern.permute.xlu1 %v686_v1  ;;  %492 = vmatprep.subr.mxu0 %v687_v2 }
  0x2f   :  { %164 = vperm.xlu1 %605, %v162_v17   ;;  %493 = vmatpush3.msra.mxu0 %v60_v18 }
  0x30   :  { %494 = vmatprep.subr.mxu0 %v687_v2  ;;  %524 = vmatpush3.msra.mxu1 %v772_v22 }
  0x31   :  { %495 = vmatpush3.msra.mxu0 %v59_v19  ;;  %525 = vmatprep.subr.mxu1 %v687_v2 }
  0x32   :  { %496 = vmatprep.subr.mxu0 %v687_v2  ;;  %526 = vmatpush3.msra.mxu1 %v777_v24 }
  0x33   :  { %497 = vmatpush3.msra.mxu0 %v58_v21  ;;  %527 = vmatprep.subr.mxu1 %v687_v2 }
  0x34   :  { %498 = vmatprep.subr.mxu0 %v687_v2  ;;  %528 = vmatpush3.msra.mxu1 %v782_v26 }
  0x35   :  { %499 = vmatpush3.msra.mxu0 %v57_v23  ;;  %529 = vmatprep.subr.mxu1 %v687_v2 }
  0x36   :  { %500 = vmatprep.subr.mxu0 %v687_v2  ;;  %530 = vmatpush3.msra.mxu1 %v787_v28 }
  0x37   :  { %501 = vmatpush3.msra.mxu0 %v56_v25  ;;  %531 = vmatprep.subr.mxu1 %v687_v2 }
  0x38   :  { %502 = vmatprep.subr.mxu0 %v687_v2  ;;  %532 = vmatpush3.msra.mxu1 %v792_v30 }
  0x39   :  { %503 = vmatpush3.msra.mxu0 %v55_v27  ;;  %533 = vmatprep.subr.mxu1 %v687_v2 }
  0x3a   :  { %504 = vmatprep.subr.mxu0 %v687_v2  ;;  %534 = vmatpush3.msra.mxu1 %v797_v32 }
  0x3b   :  { %505 = vmatpush3.msra.mxu0 %v54_v29  ;;  %535 = vmatprep.subr.mxu1 %v687_v2 }
  0x3c   :  { %506 = vmatprep.subr.mxu0 %v687_v2  ;;  %536 = vmatpush3.msra.mxu1 %v802_v34 }
  0x3d   :  { %507 = vmatpush3.msra.mxu0 %v53_v31  ;;  %537 = vmatprep.subr.mxu1 %v687_v2 }
  0x3e   :  { %508 = vmatprep.subr.mxu0 %v687_v2  ;;  %538 = vmatpush3.msra.mxu1 %v807_v36 }
  0x3f   :  { %509 = vmatpush3.msra.mxu0 %v52_v33  ;;  %539 = vmatprep.subr.mxu1 %v687_v2  ;;  %v388_v33 = vstv %s869_s0 }
  0x40   :  { %510 = vmatprep.subr.mxu0 %v687_v2  ;;  %540 = vmatpush3.msra.mxu1 %v812_v37 }
  0x41   :  { %511 = vmatpush3.msra.mxu0 %v51_v35  ;;  %606 = vset.pattern.permute.xlu0 %v691_v14 }
  0x42   :  { %550 = vmatprep.subr.mxu0 %v687_v2  ;;  %541 = vmatprep.subr.mxu1 %v687_v2 }
  0x43   :  { %542 = vmatpush3.msra.mxu1 %v817_v38 }
  0x44   :  { %543 = vmatprep.subr.mxu1 %v687_v2 }
  0x45   :  { %544 = vmatpush3.msra.mxu1 %v68_v39 }
  0x46   :  { %545 = vmatprep.subr.mxu1 %v687_v2 }
  0x47   :  { %546 = vmatpush3.msra.mxu1 %v67_v40 }
  0x9b   :  { %v88_v43 = vpop.permute.xlu0 %87  ;;  %v251_v44 = vpop.permute.xlu1 %250 }
  0x9c   :  { %vm89_vm1 = vcmp.eq.s32.totalorder %v84_v42, %v88_v43  ;;  %vm252_vm2 = vcmp.eq.s32.totalorder %v84_v42, %v251_v44 }
  0x9d   :  { %513 = vmatmul.mubr.msk.f32.vlgmr.msra.gmra.mxu0 %vm89_vm1, %v692_v45  ;;  %v425_v50 = vsel %vm252_vm2, 1.0, %v687_v2 }
  0x9e   :  { %551 = vmatpush3.msra.mxu0 %v748_v8  ;;  %582 = vmatprep.mubr.msk.f32.mxu0 %vm688_vm0, %v687_v2 }
  0x9f   :  { %552 = vmatprep.subr.mxu0 %v687_v2  ;;  %v245_v48 = vpop.permute.xlu0 %244 }
  0xa0   :  { %553 = vmatpush3.msra.mxu0 %v754_v13  ;;  %v258_v46 = vpop.permute.xlu1 %257  ;;  %vm246_vm3 = vcmp.eq.s32.totalorder %v84_v42, %v245_v48 }
  0xa1   :  { %554 = vmatprep.subr.mxu0 %v687_v2  ;;  %v424_v51 = vsel %vm246_vm3, 1.0, %v687_v2  ;;  %vm259_vm5 = vcmp.eq.s32.totalorder %v84_v42, %v258_v46 }
  0xa2   :  { %555 = vmatpush3.msra.mxu0 %v758_v16  ;;  %v255_v53 = vadd.f32 %v425_v50, %v424_v51  ;;  %v426_v54 = vsel %vm259_vm5, 1.0, %v687_v2 }
  0xa3   :  { %556 = vmatprep.subr.mxu0 %v687_v2 }
  0xa4   :  { %557 = vmatpush3.msra.mxu0 %v768_v20  ;;  %v265_v52 = vpop.permute.xlu0 %264  ;;  %v262_v55 = vadd.f32 %v426_v54, %v255_v53 }
  0xa5   :  { %558 = vmatprep.subr.mxu0 %v687_v2  ;;  %v272_v47 = vpop.permute.xlu1 %271  ;;  %vm266_vm6 = vcmp.eq.s32.totalorder %v84_v42, %v265_v52 }
  0xa6   :  { %559 = vmatpush3.msra.mxu0 %v772_v22  ;;  %v427_v56 = vsel %vm266_vm6, 1.0, %v687_v2  ;;  %vm273_vm7 = vcmp.eq.s32.totalorder %v84_v42, %v272_v47 }
  0xa7   :  { %560 = vmatprep.subr.mxu0 %v687_v2  ;;  %v269_v57 = vadd.f32 %v427_v56, %v262_v55  ;;  %v428_v58 = vsel %vm273_vm7, 1.0, %v687_v2 }
  0xa8   :  { %561 = vmatpush3.msra.mxu0 %v777_v24 }
  0xa9   :  { %562 = vmatprep.subr.mxu0 %v687_v2  ;;  %v276_v59 = vadd.f32 %v428_v58, %v269_v57 }
  0xaa   :  { %563 = vmatpush3.msra.mxu0 %v782_v26  ;;  %v165_v49 = vpop.permute.xlu1 %164 }
  0xab   :  { %vm166_vm4 = vcmp.eq.s32.totalorder %v84_v42, %v165_v49  ;;  %564 = vmatprep.subr.mxu0 %v687_v2 }
  0xac   :  { %565 = vmatpush3.msra.mxu0 %v787_v28  ;;  %548 = vmatmul.mubr.msk.f32.vlgmr.msra.gmra.mxu1 %vm166_vm4, %v692_v45 }
  0xad   :  { %566 = vmatprep.subr.mxu0 %v687_v2 }
  0xae   :  { %567 = vmatpush3.msra.mxu0 %v792_v30  ;;  %v384_v30 = vshrl.u32 %v83_v41, 7 }
  0xaf   :  { %568 = vmatprep.subr.mxu0 %v687_v2 }
  0xb0   :  { %569 = vmatpush3.msra.mxu0 %v797_v32  ;;  %vm389_vm10 = vcmp.lt.s32.totalorder %v384_v30, %v388_v33 }
  0xb1   :  { %570 = vmatprep.subr.mxu0 %v687_v2 }
  0xb2   :  { %571 = vmatpush3.msra.mxu0 %v802_v34 }
  0xb3   :  { %572 = vmatprep.subr.mxu0 %v687_v2 }
  0xb4   :  { %573 = vmatpush3.msra.mxu0 %v807_v36 }
  0xb5   :  { %574 = vmatprep.subr.mxu0 %v687_v2 }
  0xb6   :  { %575 = vmatpush3.msra.mxu0 %v812_v37 }
  0xb7   :  { %576 = vmatprep.subr.mxu0 %v687_v2 }
  0xb8   :  { %577 = vmatpush3.msra.mxu0 %v817_v38 }
  0xb9   :  { %578 = vmatprep.subr.mxu0 %v687_v2 }
  0xba   :  { %579 = vmatpush3.msra.mxu0 %v68_v39 }
  0xbb   :  { %580 = vmatprep.subr.mxu0 %v687_v2 }
  0xbc   :  { %581 = vmatpush3.msra.mxu0 %v67_v40 }
  0xbd   :  { %583 = vmatmul.mubr.f32.vlgmr.msra.gmra.mxu0 %v276_v59 }
 0x15d   :  { %v158_v60 = vpop.f32.mrf.mxu0 }
 0x15f   :  { %v514_v61 = vpop.f32.mrf.mxu0 }
 0x16c   :  { %v235_v62 = vpop.f32.mrf.mxu1 }
 0x16d   :  { %v239_v63 = vmul.f32 %v235_v62, %v158_v60 }
 0x16e   :  { %v549_v0 = vpop.f32.mrf.mxu1 }
 0x16f   :  { %240 = vadd.xlane.f32.xlu1 %v239_v63 }
 0x17d   :  { %v343_v1 = vpop.f32.mrf.mxu0 }
 0x17e   :  { %v347_v3 = vmul.f32 %v343_v1, %v158_v60 }
 0x17f   :  { %v584_v4 = vpop.f32.mrf.mxu0 }
 0x180   :  { %348 = vadd.xlane.f32.xlu0 %v347_v3 }
 0x1f8   :  { %v241_v5 = vpop.xlane.xlu1 %240 }
 0x1f9   :  { %v351_v6 = vand.u32 2147483647, %v241_v5  ;;  %v350_v31 = vmin.f32 %v241_v5, 0.0 }
 0x1fb   :  { %v352_v7 = vsub.f32 0.0, %v351_v6 }
 0x1fd   :  { %v353_v8 = vmul.f32 1.442695, %v352_v7 }
 0x1ff   :  { %607 = vpow2.f32 %v353_v8 }
 0x209   :  { %v349_v9 = vpop.xlane.xlu0 %348 }
 0x20a   :  { %v365_v10 = vsub.f32 0.0, %v349_v9 }
 0x20c   :  { %v367_v2 = vand.u32 2147483647, %v365_v10  ;;  %v608_v13 = vpop.eup %607  ;;  %v366_v32 = vmin.f32 %v365_v10, 0.0 }
 0x20d   :  { %v355_v14 = vadd.f32 1.0, %v608_v13  ;;  %v358_v17 = vmul.f32 -0.5, %v608_v13  ;;  %v361_v21 = vand.u32 2147483647, %v608_v13 }
 0x20e   :  { %v368_v11 = vsub.f32 0.0, %v367_v2 }
 0x20f   :  { %v359_v20 = vadd.f32 1.0, %v358_v17  ;;  %vm362_vm8 = vcmp.lt.f32.partialorder %v361_v21, 0.0004427343 }
 0x210   :  { %v369_v12 = vmul.f32 1.442695, %v368_v11 }
 0x211   :  { %v360_v25 = vmul.f32 %v608_v13, %v359_v20 }
 0x212   :  { %609 = vpow2.f32 %v369_v12 }
 0x213   :  { %611 = vlog2.f32 %v355_v14 }
 0x21f   :  { %v610_v15 = vpop.eup %609 }
 0x220   :  { %v371_v16 = vadd.f32 1.0, %v610_v15  ;;  %v374_v18 = vmul.f32 -0.5, %v610_v15  ;;  %v612_v19 = vpop.eup %611  ;;  %v377_v24 = vand.u32 2147483647, %v610_v15 }
 0x221   :  { %v357_v22 = vmul.f32 0.6931472, %v612_v19 }
 0x222   :  { %613 = vlog2.f32 %v371_v16  ;;  %v375_v23 = vadd.f32 1.0, %v374_v18  ;;  %vm378_vm9 = vcmp.lt.f32.partialorder %v377_v24, 0.0004427343 }
 0x223   :  { %v363_v27 = vsel %vm362_vm8, %v360_v25, %v357_v22 }
 0x224   :  { %v376_v29 = vmul.f32 %v610_v15, %v375_v23  ;;  %v364_v35 = vsub.f32 %v350_v31, %v363_v27 }
 0x22f   :  { %v614_v26 = vpop.eup %613 }
 0x230   :  { %v373_v28 = vmul.f32 0.6931472, %v614_v26 }
 0x232   :  { %v379_v34 = vsel %vm378_vm9, %v376_v29, %v373_v28 }
 0x233   :  { %v380_v36 = vsub.f32 %v366_v32, %v379_v34 }
 0x235   :  { %v381_v37 = vadd.f32 %v380_v36, %v364_v35 }
 0x237   :  { %v390_v38 = vsel %vm389_vm10, %v381_v37, 0.0 }
 0x238   :  { %v392_v39 = vsel %vm391_vm11, %v390_v38, 0.0 }
 0x239   :  { %393 = vadd.xlane.f32.xlu0 %v392_v39 }
 0x2c2   :  { %v394_v40 = vpop.xlane.xlu0 %393 }
 0x2c3   :  { %v395_v42 = vrot.slane %v394_v40, 4 }
 0x2c5   :  { %v396_v43 = vadd.f32 %v395_v42, %v394_v40 }
 0x2c7   :  { %v397_v41 = vrot.slane %v396_v43, 2 }
 0x2c9   :  { %v398_v44 = vadd.f32 %v397_v41, %v396_v43 }
 0x2cb   :  { %v399_v45 = vrot.slane %v398_v44, 1 }
 0x2cd   :  { %v400_v46 = vadd.f32 %v399_v45, %v398_v44 }
 0x2cf   :  { %585 = vpush %v400_v46 }
 0x300   :  { %s586_s0 = spop %585 }
 0x301   :  { %v402_v47 = vstv %s586_s0 }
 0x302   :  { %403 = vst [vmem:[#allocation9] sm:$0xff] %v402_v47 }
 0x303   :  { %666 = shalt.err (!%p663_p0)
}
 0x304   :  { %413 = dma.vmem_to_hbm [thread:$0]  %s411_s13, 128, %s875_s6, [#allocation6]  }
 0x305   :  { %679 = dma.done.wait [#allocation6], 128  }
 0x306   :  { %680 = vsyncadd [#allocation6], 4294967168 }
 0x307   :  { %417 = vsyncpa [#allocation5], 1 }
 0x308   :  { %418 = vsyncpa [#allocation8], 1 }
 0x309   :  { %419 = vsyncpa [#allocation6], 1 }

</bundles_post_ra>
